<compile_context>
chip_gen: v7x
topology: tpu7x:2x2x1
jax: 0.10.0
libtpu: 0.0.40
codegen_flags: <defaults>
</compile_context>

<pallas_src>
import math

import jax
import jax.numpy as jnp
from jax.experimental import pallas as pl
from jax.experimental.pallas import tpu as pltpu

# ----------------------------- tiny BERT config -----------------------------
VOCAB = 100
TYPE_VOCAB = 2
MAX_POS = 16
HIDDEN = 32
NUM_LAYERS = 2
NUM_HEADS = 2
HEAD_DIM = HIDDEN // NUM_HEADS
INTERMEDIATE = 64
LN_EPS = 1e-12          # HF BertLayerNorm default
BATCH = 2
SEQ = 8

# Packed per-layer small-parameter slab: one DMA per layer instead of six.
_PK_COLS = max(3 * HIDDEN, INTERMEDIATE)            # 96
(_ROW_BQKV, _ROW_BO, _ROW_BI, _ROW_BO2,
 _ROW_LN1G, _ROW_LN1B, _ROW_LN2G, _ROW_LN2B) = range(8)
_PK_ROWS = 8


# --------------------------- fused encoder kernel ---------------------------
def _layernorm(x, gamma, beta):
    """LayerNorm over the hidden (last / lane) axis, float32 math."""
    mu = jnp.mean(x, axis=-1, keepdims=True)
    d = x - mu
    var = jnp.mean(d * d, axis=-1, keepdims=True)
    return d * jax.lax.rsqrt(var + LN_EPS) * gamma + beta


def _gelu(y):
    # TODO(synk): HF BertModel's default hidden_act='gelu' is the exact erf
    #             GELU; the tanh approximation ('gelu_new') is used here.
    #             Kept in f32 so the same code is correct on v5e (no bf16 EUP).
    return 0.5 * y * (1.0 + jnp.tanh(0.7978845608028654 *
                                     (y + 0.044715 * y * y * y)))


def _encoder_kernel(h0_ref, mask_ref,
                    wqkv_ref, wo_ref, wi_ref, wo2_ref, small_ref,
                    h_ref):
    """Grid = (batch, layer).  One step = one transformer layer on one batch
    element; the (L, H) activation block h_ref stays VMEM-resident across the
    inner ("arbitrary") layer axis."""
    L, H = h_ref.shape
    nH, dH, I = NUM_HEADS, HEAD_DIM, INTERMEDIATE
    scale = 1.0 / math.sqrt(dH)

    # Layer 0: seed the resident activation from the (HBM-aliased) embedding
    # LayerNorm slab computed in the wrapper.
    @pl.when(pl.program_id(1) == 0)
    def _():
        h_ref[...] = h0_ref[...]

    x = h_ref[...]                                        # [L, H] f32
    xb = x.astype(jnp.bfloat16)

    # Unpack the per-layer small parameters (one [8, 96] slab).
    small = small_ref[0]                                  # [8, 96] f32
    bqkv = small[_ROW_BQKV:_ROW_BQKV + 1, 0:3 * H]        # [1, 3H]
    bo = small[_ROW_BO:_ROW_BO + 1, 0:H]                  # [1, H]
    bi = small[_ROW_BI:_ROW_BI + 1, 0:I]                  # [1, I]
    bo2 = small[_ROW_BO2:_ROW_BO2 + 1, 0:H]               # [1, H]
    g1 = small[_ROW_LN1G:_ROW_LN1G + 1, 0:H]
    b1 = small[_ROW_LN1B:_ROW_LN1B + 1, 0:H]
    g2 = small[_ROW_LN2G:_ROW_LN2G + 1, 0:H]
    b2 = small[_ROW_LN2B:_ROW_LN2B + 1, 0:H]

    # ---- fused QKV projection: one MXU pass with N = 3H ----
    qkv = jnp.dot(xb, wqkv_ref[0],
                  preferred_element_type=jnp.float32) + bqkv       # [L, 3H]

    # ---- head-batched multi-head self-attention (no per-head loop/concat) --
    # [L, nH, dH] -> [nH, L, dH] via lane-layout-aware relayout, then a single
    # leading-batch contraction per step.
    q = pltpu.einshape("lhd->hld", qkv[:, 0 * H:1 * H].reshape(L, nH, dH))
    k = pltpu.einshape("lhd->hld", qkv[:, 1 * H:2 * H].reshape(L, nH, dH))
    v = pltpu.einshape("lhd->hld", qkv[:, 2 * H:3 * H].reshape(L, nH, dH))
    qb = q.astype(jnp.bfloat16)
    kb = k.astype(jnp.bfloat16)
    vb = v.astype(jnp.bfloat16)

    s = jnp.einsum('hqd,hkd->hqk', qb, kb,
                   preferred_element_type=jnp.float32) * scale     # [nH, L, L]
    s = s + mask_ref[...]                                          # [1,1,L] bias
    s = s - jnp.max(s, axis=-1, keepdims=True)
    p = jnp.exp(s)
    p = p * pl.reciprocal(jnp.sum(p, axis=-1, keepdims=True), approx=True)
    ctx = jnp.einsum('hqk,hkd->hqd', p.astype(jnp.bfloat16), vb,
                     preferred_element_type=jnp.float32)           # [nH, L, dH]
    ctx = pltpu.einshape("hld->lhd", ctx).reshape(L, H)            # [L, H]

    # ---- attention output projection + add & LayerNorm ----
    attn_out = jnp.dot(ctx.astype(jnp.bfloat16), wo_ref[0],
                       preferred_element_type=jnp.float32) + bo
    h1 = _layernorm(attn_out + x, g1, b1)

    # ---- feed-forward (GELU) + add & LayerNorm ----
    inter = jnp.dot(h1.astype(jnp.bfloat16), wi_ref[0],
                    preferred_element_type=jnp.float32) + bi
    inter = _gelu(inter)
    ffn = jnp.dot(inter.astype(jnp.bfloat16), wo2_ref[0],
                  preferred_element_type=jnp.float32) + bo2
    h_ref[...] = _layernorm(ffn + h1, g2, b2)


# ------------------------------ parameter init ------------------------------
def init_params(key):
    def nrm(k, shape, dtype=jnp.float32):
        return (jax.random.normal(k, shape, jnp.float32) * 0.02).astype(dtype)

    keys = jax.random.split(key, 7)
    H, I, H3 = HIDDEN, INTERMEDIATE, 3 * HIDDEN

    # Packed per-layer vector params [NL, 8, 96]:
    #   row 0 bqkv | 1 bo | 2 bi | 3 bo2 | 4 ln1_g | 5 ln1_b | 6 ln2_g | 7 ln2_b
    small = jnp.zeros((NUM_LAYERS, _PK_ROWS, _PK_COLS), jnp.float32)
    small = small.at[:, _ROW_LN1G, :H].set(1.0)
    small = small.at[:, _ROW_LN2G, :H].set(1.0)
    # biases / LN betas stay zero (fresh-init convention).

    return {
        # embeddings (f32; row gathers + embedding LayerNorm run in XLA glue)
        "word_emb": nrm(keys[0], (VOCAB, H)),
        "pos_emb": nrm(keys[1], (MAX_POS, H)),
        "type_emb": nrm(keys[2], (TYPE_VOCAB, H)),
        "emb_ln_gamma": jnp.ones((H,), jnp.float32),
        "emb_ln_beta": jnp.zeros((H,), jnp.float32),
        # per-layer matmul weights, stacked on a leading layer axis, bf16.
        # TODO(synk): real checkpoint weights would be cast at matmul time if
        #             bit-matching the f32 PyTorch reference matters.
        "wqkv": nrm(keys[3], (NUM_LAYERS, H, H3), jnp.bfloat16),
        "wo": nrm(keys[4], (NUM_LAYERS, H, H), jnp.bfloat16),
        "wi": nrm(keys[5], (NUM_LAYERS, H, I), jnp.bfloat16),
        "wo2": nrm(keys[6], (NUM_LAYERS, I, H), jnp.bfloat16),
        "small": small,
    }


# -------------------------------- forward pass -------------------------------
def bert_encoder_forward(params, text_feats):
    """text_feats: [B, 3, L] int32 -> last_hidden_state [B, L, H] float32."""
    input_ids = text_feats[:, 0]
    attn_mask = text_feats[:, 1].astype(jnp.float32)
    token_type = text_feats[:, 2]
    B, L = input_ids.shape
    M = B * L
    H, H3, I = HIDDEN, 3 * HIDDEN, INTERMEDIATE

    # --- embeddings + embedding LayerNorm (tiny; gathers are XLA glue) ---
    word = jnp.take(params["word_emb"], input_ids, axis=0)           # [B, L, H]
    pos = params["pos_emb"][:L][None, :, :]                          # [1, L, H]
    tok = jnp.take(params["type_emb"], token_type, axis=0)           # [B, L, H]
    emb = (word + pos + tok).reshape(M, H)
    mu = jnp.mean(emb, axis=-1, keepdims=True)
    d = emb - mu
    var = jnp.mean(d * d, axis=-1, keepdims=True)
    h0 = (d * jax.lax.rsqrt(var + LN_EPS) * params["emb_ln_gamma"]
          + params["emb_ln_beta"])                                   # [M, H]

    # HF extended attention mask: additive bias, 0 attend / -1e4 masked.
    mask_bias = ((1.0 - attn_mask) * -10000.0)[:, None, :]           # [B, 1, L]

    wmap = lambda b, l: (l, 0, 0)        # per-layer weight slabs
    hmap = lambda b, l: (b, 0)           # per-batch activation tile (layer-resident)

    h = pl.pallas_call(
        _encoder_kernel,
        out_shape=jax.ShapeDtypeStruct((M, H), jnp.float32),
        grid_spec=pltpu.PrefetchScalarGridSpec(
            num_scalar_prefetch=0,
            grid=(B, NUM_LAYERS),
            in_specs=[
                pl.BlockSpec((L, H), hmap),                          # h0 (aliased)
                pl.BlockSpec((1, 1, L), lambda b, l: (b, 0, 0)),     # mask bias
                pl.BlockSpec((1, H, H3), wmap),                      # wqkv
                pl.BlockSpec((1, H, H), wmap),                       # wo
                pl.BlockSpec((1, H, I), wmap),                       # wi
                pl.BlockSpec((1, I, H), wmap),                       # wo2
                pl.BlockSpec((1, _PK_ROWS, _PK_COLS), wmap),         # packed biases/LN
            ],
            out_specs=pl.BlockSpec((L, H), hmap),                    # resident h
        ),
        input_output_aliases={0: 0},     # emb slab reuses the output HBM buffer
        compiler_params=pltpu.CompilerParams(
            dimension_semantics=("parallel", "arbitrary"),
            # Explicit budget; size from (weights + resident tiles) at real dims.
            vmem_limit_bytes=32 * 1024 * 1024),
    )(h0, mask_bias,
      params["wqkv"], params["wo"], params["wi"], params["wo2"],
      params["small"])

    # dropout layers are identity in eval mode
    return h.reshape(B, L, H)


# ----------------------------------- main ------------------------------------
if __name__ == "__main__":
    root = jax.random.PRNGKey(0)
    k_params, k_ids, k_types = jax.random.split(root, 3)

    params = init_params(k_params)

    input_ids = jax.random.randint(k_ids, (BATCH, SEQ), 0, VOCAB, jnp.int32)
    # attention mask: second example has the last 3 positions padded out.
    attention_mask = jnp.array(
        [[1, 1, 1, 1, 1, 1, 1, 1],
         [1, 1, 1, 1, 1, 0, 0, 0]], dtype=jnp.int32)
    token_type_ids = jax.random.randint(k_types, (BATCH, SEQ), 0, TYPE_VOCAB,
                                        jnp.int32)
    text_feats = jnp.stack([input_ids, attention_mask, token_type_ids], axis=1)

    fwd = jax.jit(bert_encoder_forward)
    last_hidden_state = fwd(params, text_feats)
    last_hidden_state = jax.block_until_ready(last_hidden_state)

    assert last_hidden_state.shape == (BATCH, SEQ, HIDDEN)
    assert last_hidden_state.dtype == jnp.float32
    assert bool(jnp.all(jnp.isfinite(last_hidden_state)))
    print("KERNEL_OK")
</pallas_src>

<mosaic_0001>
module attributes {stable_mosaic.version = 11 : i64} {
  func.func @_encoder_kernel(%arg0: i32, %arg1: i32, %arg2: memref<8x32xf32, #tpu.memory_space<vmem>>, %arg3: memref<1x1x8xf32, #tpu.memory_space<vmem>>, %arg4: memref<1x32x96xbf16, #tpu.memory_space<vmem>>, %arg5: memref<1x32x32xbf16, #tpu.memory_space<vmem>>, %arg6: memref<1x32x64xbf16, #tpu.memory_space<vmem>>, %arg7: memref<1x64x32xbf16, #tpu.memory_space<vmem>>, %arg8: memref<1x8x96xf32, #tpu.memory_space<vmem>>, %arg9: memref<8x32xf32, #tpu.memory_space<vmem>>) attributes {dimension_semantics = [#tpu.dimension_semantics<parallel>, #tpu.dimension_semantics<arbitrary>], iteration_bounds = array<i64: 2, 2>, scalar_prefetch = 0 : i64, scratch_operands = 0 : i64, tpu.core_type = #tpu.core_type<tc>, window_params = [{transform_indices = @transform_0, window_bounds = array<i64: 8, 32>}, {transform_indices = @transform_1, window_bounds = array<i64: 1, 1, 8>}, {transform_indices = @transform_2, window_bounds = array<i64: 1, 32, 96>}, {transform_indices = @transform_3, window_bounds = array<i64: 1, 32, 32>}, {transform_indices = @transform_4, window_bounds = array<i64: 1, 32, 64>}, {transform_indices = @transform_5, window_bounds = array<i64: 1, 64, 32>}, {transform_indices = @transform_6, window_bounds = array<i64: 1, 8, 96>}, {transform_indices = @transform_7, window_bounds = array<i64: 8, 32>}]} {
    %c0_i32 = arith.constant 0 : i32
    %0 = arith.cmpi eq, %arg1, %c0_i32 : i32
    %1 = arith.extui %0 : i1 to i32
    %c0_i32_0 = arith.constant 0 : i32
    %2 = arith.cmpi ne, %1, %c0_i32_0 : i32
    scf.if %2 {
      %c0_44 = arith.constant 0 : index
      %c0_45 = arith.constant 0 : index
      %126 = vector.load %arg2[%c0_44, %c0_45] : memref<8x32xf32, #tpu.memory_space<vmem>>, vector<8x32xf32>
      %c0_46 = arith.constant 0 : index
      %c0_47 = arith.constant 0 : index
      %127 = vector.load %arg9[%c0_46, %c0_47] : memref<8x32xf32, #tpu.memory_space<vmem>>, vector<8x32xf32>
      tpu.vector_store %arg9[%c0_46, %c0_47], %126 {strides = array<i32>} : memref<8x32xf32, #tpu.memory_space<vmem>>, vector<8x32xf32>,
    } else {
    }
    %c0 = arith.constant 0 : index
    %c0_1 = arith.constant 0 : index
    %3 = vector.load %arg9[%c0, %c0_1] : memref<8x32xf32, #tpu.memory_space<vmem>>, vector<8x32xf32>
    %4 = arith.truncf %3 : vector<8x32xf32> to vector<8x32xbf16>
    %c0_2 = arith.constant 0 : index
    %c0_3 = arith.constant 0 : index
    %c0_4 = arith.constant 0 : index
    %5 = vector.load %arg8[%c0_2, %c0_3, %c0_4] : memref<1x8x96xf32, #tpu.memory_space<vmem>>, vector<1x8x96xf32>
    %6 = vector.shape_cast %5 : vector<1x8x96xf32> to vector<8x96xf32>
    %7 = vector.extract_strided_slice %6 {offsets = [0, 0], sizes = [1, 96], strides = [1, 1]} : vector<8x96xf32> to vector<1x96xf32>
    %8 = vector.extract_strided_slice %6 {offsets = [1, 0], sizes = [1, 32], strides = [1, 1]} : vector<8x96xf32> to vector<1x32xf32>
    %9 = vector.extract_strided_slice %6 {offsets = [2, 0], sizes = [1, 64], strides = [1, 1]} : vector<8x96xf32> to vector<1x64xf32>
    %10 = vector.extract_strided_slice %6 {offsets = [3, 0], sizes = [1, 32], strides = [1, 1]} : vector<8x96xf32> to vector<1x32xf32>
    %11 = vector.extract_strided_slice %6 {offsets = [4, 0], sizes = [1, 32], strides = [1, 1]} : vector<8x96xf32> to vector<1x32xf32>
    %12 = vector.extract_strided_slice %6 {offsets = [5, 0], sizes = [1, 32], strides = [1, 1]} : vector<8x96xf32> to vector<1x32xf32>
    %13 = vector.extract_strided_slice %6 {offsets = [6, 0], sizes = [1, 32], strides = [1, 1]} : vector<8x96xf32> to vector<1x32xf32>
    %14 = vector.extract_strided_slice %6 {offsets = [7, 0], sizes = [1, 32], strides = [1, 1]} : vector<8x96xf32> to vector<1x32xf32>
    %c0_5 = arith.constant 0 : index
    %c0_6 = arith.constant 0 : index
    %c0_7 = arith.constant 0 : index
    %15 = vector.load %arg4[%c0_5, %c0_6, %c0_7] : memref<1x32x96xbf16, #tpu.memory_space<vmem>>, vector<1x32x96xbf16>
    %16 = vector.shape_cast %15 : vector<1x32x96xbf16> to vector<32x96xbf16>
    %cst = arith.constant dense<0.000000e+00> : vector<8x96xf32>
    %17 = tpu.matmul %4, %16, %cst {dimension_numbers = #tpu.dot_dimension_numbers<[1], [0], [0], [1], [0, 0, 1, 1], [], []>} : vector<8x32xbf16>, vector<32x96xbf16>, vector<8x96xf32> -> vector<8x96xf32>
    %18 = vector.broadcast %7 : vector<1x96xf32> to vector<8x96xf32>
    %19 = arith.addf %17, %18 : vector<8x96xf32>
    %20 = vector.extract_strided_slice %19 {offsets = [0, 0], sizes = [8, 32], strides = [1, 1]} : vector<8x96xf32> to vector<8x32xf32>
    %21 = vector.shape_cast %20 : vector<8x32xf32> to vector<8x2x16xf32>
    %22 = tpu.transpose %21, [1, 0, 2] : vector<8x2x16xf32> -> vector<2x8x16xf32>
    %23 = vector.extract_strided_slice %19 {offsets = [0, 32], sizes = [8, 32], strides = [1, 1]} : vector<8x96xf32> to vector<8x32xf32>
    %24 = vector.shape_cast %23 : vector<8x32xf32> to vector<8x2x16xf32>
    %25 = tpu.transpose %24, [1, 0, 2] : vector<8x2x16xf32> -> vector<2x8x16xf32>
    %26 = vector.extract_strided_slice %19 {offsets = [0, 64], sizes = [8, 32], strides = [1, 1]} : vector<8x96xf32> to vector<8x32xf32>
    %27 = vector.shape_cast %26 : vector<8x32xf32> to vector<8x2x16xf32>
    %28 = tpu.transpose %27, [1, 0, 2] : vector<8x2x16xf32> -> vector<2x8x16xf32>
    %29 = arith.truncf %22 : vector<2x8x16xf32> to vector<2x8x16xbf16>
    %30 = arith.truncf %25 : vector<2x8x16xf32> to vector<2x8x16xbf16>
    %31 = arith.truncf %28 : vector<2x8x16xf32> to vector<2x8x16xbf16>
    "tpu.trace_start"() <{level = 10 : i32, message = "hqd,hkd->hqk"}> : () -> ()
    %cst_8 = arith.constant dense<0.000000e+00> : vector<2x8x8xf32>
    %32 = tpu.matmul %29, %30, %cst_8 {dimension_numbers = #tpu.dot_dimension_numbers<[2], [2], [1], [1], [0, 0, 0, 1, 1, 1], [0], [0]>} : vector<2x8x16xbf16>, vector<2x8x16xbf16>, vector<2x8x8xf32> -> vector<2x8x8xf32>
    "tpu.trace_stop"() : () -> ()
    %cst_9 = arith.constant 2.500000e-01 : f32
    %33 = vector.broadcast %cst_9 : f32 to vector<2x8x8xf32>
    %34 = arith.mulf %32, %33 : vector<2x8x8xf32>
    %c0_10 = arith.constant 0 : index
    %c0_11 = arith.constant 0 : index
    %c0_12 = arith.constant 0 : index
    %35 = vector.load %arg3[%c0_10, %c0_11, %c0_12] : memref<1x1x8xf32, #tpu.memory_space<vmem>>, vector<1x1x8xf32>
    %36 = vector.broadcast %35 : vector<1x1x8xf32> to vector<2x8x8xf32>
    %37 = arith.addf %34, %36 : vector<2x8x8xf32>
    %cst_13 = arith.constant dense<0xFF800000> : vector<2x8xf32>
    %38 = vector.multi_reduction <maximumf>, %37, %cst_13 [2] : vector<2x8x8xf32> to vector<2x8xf32>
    %39 = vector.shape_cast %38 : vector<2x8xf32> to vector<2x8x1xf32>
    %40 = vector.broadcast %39 : vector<2x8x1xf32> to vector<2x8x8xf32>
    %41 = arith.subf %37, %40 : vector<2x8x8xf32>
    %42 = math.exp %41 : vector<2x8x8xf32>
    %cst_14 = arith.constant dense<0.000000e+00> : vector<2x8xf32>
    %43 = vector.multi_reduction <add>, %42, %cst_14 [2] : vector<2x8x8xf32> to vector<2x8xf32>
    %44 = vector.shape_cast %43 : vector<2x8xf32> to vector<2x8x1xf32>
    %45 = tpu.reciprocal %44 {approx = true} : vector<2x8x1xf32> -> vector<2x8x1xf32>
    %46 = vector.broadcast %45 : vector<2x8x1xf32> to vector<2x8x8xf32>
    %47 = arith.mulf %42, %46 : vector<2x8x8xf32>
    %48 = arith.truncf %47 : vector<2x8x8xf32> to vector<2x8x8xbf16>
    "tpu.trace_start"() <{level = 10 : i32, message = "hqk,hkd->hqd"}> : () -> ()
    %cst_15 = arith.constant dense<0.000000e+00> : vector<2x8x16xf32>
    %49 = tpu.matmul %48, %31, %cst_15 {dimension_numbers = #tpu.dot_dimension_numbers<[2], [1], [1], [2], [0, 0, 0, 1, 1, 2], [0], [0]>} : vector<2x8x8xbf16>, vector<2x8x16xbf16>, vector<2x8x16xf32> -> vector<2x8x16xf32>
    "tpu.trace_stop"() : () -> ()
    %50 = tpu.transpose %49, [1, 0, 2] : vector<2x8x16xf32> -> vector<8x2x16xf32>
    %51 = vector.shape_cast %50 : vector<8x2x16xf32> to vector<8x32xf32>
    %52 = arith.truncf %51 : vector<8x32xf32> to vector<8x32xbf16>
    %c0_16 = arith.constant 0 : index
    %c0_17 = arith.constant 0 : index
    %c0_18 = arith.constant 0 : index
    %53 = vector.load %arg5[%c0_16, %c0_17, %c0_18] : memref<1x32x32xbf16, #tpu.memory_space<vmem>>, vector<1x32x32xbf16>
    %54 = vector.shape_cast %53 : vector<1x32x32xbf16> to vector<32x32xbf16>
    %cst_19 = arith.constant dense<0.000000e+00> : vector<8x32xf32>
    %55 = tpu.matmul %52, %54, %cst_19 {dimension_numbers = #tpu.dot_dimension_numbers<[1], [0], [0], [1], [0, 0, 1, 1], [], []>} : vector<8x32xbf16>, vector<32x32xbf16>, vector<8x32xf32> -> vector<8x32xf32>
    %56 = vector.broadcast %8 : vector<1x32xf32> to vector<8x32xf32>
    %57 = arith.addf %55, %56 : vector<8x32xf32>
    %58 = arith.addf %57, %3 : vector<8x32xf32>
    %cst_20 = arith.constant dense<0.000000e+00> : vector<8xf32>
    %59 = vector.multi_reduction <add>, %58, %cst_20 [1] : vector<8x32xf32> to vector<8xf32>
    %60 = vector.shape_cast %59 : vector<8xf32> to vector<8x1xf32>
    %cst_21 = arith.constant 3.200000e+01 : f32
    %61 = vector.broadcast %cst_21 : f32 to vector<8x1xf32>
    %62 = arith.divf %60, %61 : vector<8x1xf32>
    %63 = vector.broadcast %62 : vector<8x1xf32> to vector<8x32xf32>
    %64 = arith.subf %58, %63 : vector<8x32xf32>
    %65 = arith.mulf %64, %64 : vector<8x32xf32>
    %cst_22 = arith.constant dense<0.000000e+00> : vector<8xf32>
    %66 = vector.multi_reduction <add>, %65, %cst_22 [1] : vector<8x32xf32> to vector<8xf32>
    %67 = vector.shape_cast %66 : vector<8xf32> to vector<8x1xf32>
    %cst_23 = arith.constant 3.200000e+01 : f32
    %68 = vector.broadcast %cst_23 : f32 to vector<8x1xf32>
    %69 = arith.divf %67, %68 : vector<8x1xf32>
    %cst_24 = arith.constant 9.99999996E-13 : f32
    %70 = vector.broadcast %cst_24 : f32 to vector<8x1xf32>
    %71 = arith.addf %69, %70 : vector<8x1xf32>
    %72 = math.rsqrt %71 : vector<8x1xf32>
    %73 = vector.broadcast %72 : vector<8x1xf32> to vector<8x32xf32>
    %74 = arith.mulf %64, %73 : vector<8x32xf32>
    %75 = vector.broadcast %11 : vector<1x32xf32> to vector<8x32xf32>
    %76 = arith.mulf %74, %75 : vector<8x32xf32>
    %77 = vector.broadcast %12 : vector<1x32xf32> to vector<8x32xf32>
    %78 = arith.addf %76, %77 : vector<8x32xf32>
    %79 = arith.truncf %78 : vector<8x32xf32> to vector<8x32xbf16>
    %c0_25 = arith.constant 0 : index
    %c0_26 = arith.constant 0 : index
    %c0_27 = arith.constant 0 : index
    %80 = vector.load %arg6[%c0_25, %c0_26, %c0_27] : memref<1x32x64xbf16, #tpu.memory_space<vmem>>, vector<1x32x64xbf16>
    %81 = vector.shape_cast %80 : vector<1x32x64xbf16> to vector<32x64xbf16>
    %cst_28 = arith.constant dense<0.000000e+00> : vector<8x64xf32>
    %82 = tpu.matmul %79, %81, %cst_28 {dimension_numbers = #tpu.dot_dimension_numbers<[1], [0], [0], [1], [0, 0, 1, 1], [], []>} : vector<8x32xbf16>, vector<32x64xbf16>, vector<8x64xf32> -> vector<8x64xf32>
    %83 = vector.broadcast %9 : vector<1x64xf32> to vector<8x64xf32>
    %84 = arith.addf %82, %83 : vector<8x64xf32>
    %cst_29 = arith.constant 5.000000e-01 : f32
    %85 = vector.broadcast %cst_29 : f32 to vector<8x64xf32>
    %86 = arith.mulf %85, %84 : vector<8x64xf32>
    %cst_30 = arith.constant 4.471500e-02 : f32
    %87 = vector.broadcast %cst_30 : f32 to vector<8x64xf32>
    %88 = arith.mulf %87, %84 : vector<8x64xf32>
    %89 = arith.mulf %88, %84 : vector<8x64xf32>
    %90 = arith.mulf %89, %84 : vector<8x64xf32>
    %91 = arith.addf %84, %90 : vector<8x64xf32>
    %cst_31 = arith.constant 0.797884583 : f32
    %92 = vector.broadcast %cst_31 : f32 to vector<8x64xf32>
    %93 = arith.mulf %92, %91 : vector<8x64xf32>
    %94 = math.tanh %93 : vector<8x64xf32>
    %cst_32 = arith.constant 1.000000e+00 : f32
    %95 = vector.broadcast %cst_32 : f32 to vector<8x64xf32>
    %96 = arith.addf %95, %94 : vector<8x64xf32>
    %97 = arith.mulf %86, %96 : vector<8x64xf32>
    %98 = arith.truncf %97 : vector<8x64xf32> to vector<8x64xbf16>
    %c0_33 = arith.constant 0 : index
    %c0_34 = arith.constant 0 : index
    %c0_35 = arith.constant 0 : index
    %99 = vector.load %arg7[%c0_33, %c0_34, %c0_35] : memref<1x64x32xbf16, #tpu.memory_space<vmem>>, vector<1x64x32xbf16>
    %100 = vector.shape_cast %99 : vector<1x64x32xbf16> to vector<64x32xbf16>
    %cst_36 = arith.constant dense<0.000000e+00> : vector<8x32xf32>
    %101 = tpu.matmul %98, %100, %cst_36 {dimension_numbers = #tpu.dot_dimension_numbers<[1], [0], [0], [1], [0, 0, 1, 1], [], []>} : vector<8x64xbf16>, vector<64x32xbf16>, vector<8x32xf32> -> vector<8x32xf32>
    %102 = vector.broadcast %10 : vector<1x32xf32> to vector<8x32xf32>
    %103 = arith.addf %101, %102 : vector<8x32xf32>
    %104 = arith.addf %103, %78 : vector<8x32xf32>
    %cst_37 = arith.constant dense<0.000000e+00> : vector<8xf32>
    %105 = vector.multi_reduction <add>, %104, %cst_37 [1] : vector<8x32xf32> to vector<8xf32>
    %106 = vector.shape_cast %105 : vector<8xf32> to vector<8x1xf32>
    %cst_38 = arith.constant 3.200000e+01 : f32
    %107 = vector.broadcast %cst_38 : f32 to vector<8x1xf32>
    %108 = arith.divf %106, %107 : vector<8x1xf32>
    %109 = vector.broadcast %108 : vector<8x1xf32> to vector<8x32xf32>
    %110 = arith.subf %104, %109 : vector<8x32xf32>
    %111 = arith.mulf %110, %110 : vector<8x32xf32>
    %cst_39 = arith.constant dense<0.000000e+00> : vector<8xf32>
    %112 = vector.multi_reduction <add>, %111, %cst_39 [1] : vector<8x32xf32> to vector<8xf32>
    %113 = vector.shape_cast %112 : vector<8xf32> to vector<8x1xf32>
    %cst_40 = arith.constant 3.200000e+01 : f32
    %114 = vector.broadcast %cst_40 : f32 to vector<8x1xf32>
    %115 = arith.divf %113, %114 : vector<8x1xf32>
    %cst_41 = arith.constant 9.99999996E-13 : f32
    %116 = vector.broadcast %cst_41 : f32 to vector<8x1xf32>
    %117 = arith.addf %115, %116 : vector<8x1xf32>
    %118 = math.rsqrt %117 : vector<8x1xf32>
    %119 = vector.broadcast %118 : vector<8x1xf32> to vector<8x32xf32>
    %120 = arith.mulf %110, %119 : vector<8x32xf32>
    %121 = vector.broadcast %13 : vector<1x32xf32> to vector<8x32xf32>
    %122 = arith.mulf %120, %121 : vector<8x32xf32>
    %123 = vector.broadcast %14 : vector<1x32xf32> to vector<8x32xf32>
    %124 = arith.addf %122, %123 : vector<8x32xf32>
    %c0_42 = arith.constant 0 : index
    %c0_43 = arith.constant 0 : index
    %125 = vector.load %arg9[%c0_42, %c0_43] : memref<8x32xf32, #tpu.memory_space<vmem>>, vector<8x32xf32>
    tpu.vector_store %arg9[%c0_42, %c0_43], %124 {strides = array<i32>} : memref<8x32xf32, #tpu.memory_space<vmem>>, vector<8x32xf32>,
    return
  }
  func.func @transform_0(%arg0: i32, %arg1: i32) -> (i32, i32) {
    %c0_i32 = arith.constant 0 : i32
    %c0_i32_0 = arith.constant 0 : i32
    return %arg0, %c0_i32 : i32, i32
  }
  func.func @transform_1(%arg0: i32, %arg1: i32) -> (i32, i32, i32) {
    %c0_i32 = arith.constant 0 : i32
    %c0_i32_0 = arith.constant 0 : i32
    %c0_i32_1 = arith.constant 0 : i32
    return %arg0, %c0_i32, %c0_i32_0 : i32, i32, i32
  }
  func.func @transform_2(%arg0: i32, %arg1: i32) -> (i32, i32, i32) {
    %c0_i32 = arith.constant 0 : i32
    %c0_i32_0 = arith.constant 0 : i32
    %c0_i32_1 = arith.constant 0 : i32
    return %arg1, %c0_i32, %c0_i32_0 : i32, i32, i32
  }
  func.func @transform_3(%arg0: i32, %arg1: i32) -> (i32, i32, i32) {
    %c0_i32 = arith.constant 0 : i32
    %c0_i32_0 = arith.constant 0 : i32
    %c0_i32_1 = arith.constant 0 : i32
    return %arg1, %c0_i32, %c0_i32_0 : i32, i32, i32
  }
  func.func @transform_4(%arg0: i32, %arg1: i32) -> (i32, i32, i32) {
    %c0_i32 = arith.constant 0 : i32
    %c0_i32_0 = arith.constant 0 : i32
    %c0_i32_1 = arith.constant 0 : i32
    return %arg1, %c0_i32, %c0_i32_0 : i32, i32, i32
  }
  func.func @transform_5(%arg0: i32, %arg1: i32) -> (i32, i32, i32) {
    %c0_i32 = arith.constant 0 : i32
    %c0_i32_0 = arith.constant 0 : i32
    %c0_i32_1 = arith.constant 0 : i32
    return %arg1, %c0_i32, %c0_i32_0 : i32, i32, i32
  }
  func.func @transform_6(%arg0: i32, %arg1: i32) -> (i32, i32, i32) {
    %c0_i32 = arith.constant 0 : i32
    %c0_i32_0 = arith.constant 0 : i32
    %c0_i32_1 = arith.constant 0 : i32
    return %arg1, %c0_i32, %c0_i32_0 : i32, i32, i32
  }
  func.func @transform_7(%arg0: i32, %arg1: i32) -> (i32, i32) {
    %c0_i32 = arith.constant 0 : i32
    %c0_i32_0 = arith.constant 0 : i32
    return %arg0, %c0_i32 : i32, i32
  }
}

</mosaic_0001>

<bundles_post_ra>
// kernel: mul.0
= control target key start
LH: loop header
LB: loop body
LE: loop exit
PB: predicated region body
PF: predicated region fallthrough
CT: control target
= control target key end

     0   :  { %s56_s0 = inlined_call_operand.vmem [shape: f32[2,1,8], index: 0, kind: input, shape index: {}]   ;;  %s57_s1 = inlined_call_operand.vmem [shape: f32[2,1,8], index: 1, kind: input, shape index: {}]   ;;  %s58_s2 = inlined_call_operand.vmem [shape: f32[2,1,8], index: 2, kind: output, shape index: {}]  }
   0x1   :  { %v3_v0 = vld [vmem:[%s56_s0] sm:$0x1]  ;;  %v20_v2 = vld [vmem:[%s56_s0 + $0x1] sm:$0x1] }
   0x2   :  { %v4_v1 = vld [vmem:[%s57_s1] sm:$0x1]  ;;  %v21_v4 = vld [vmem:[%s57_s1 + $0x1] sm:$0x1] }
   0x3   :  { %v7_v3 = vmul.f32 %v4_v1, %v3_v0  ;;  %v16_v5 = vmul.f32 %v21_v4, %v20_v2 }
   0x5   :  { %9 = vst [vmem:[%s58_s2] sm:$0x1] %v7_v3  ;;  %22 = vst [vmem:[%s58_s2 + $0x1] sm:$0x1] %v16_v5 }

// kernel: bert_encoder_forward.1
= control target key start
LH: loop header
LB: loop body
LE: loop exit
PB: predicated region body
PF: predicated region fallthrough
CT: control target
= control target key end

     0   :  { %s1878_s24 = smov 0   ;;  %s1880_s25 = smov 0   ;;  %s2137_s0 = inlined_call_operand.vmem [shape: f32[16,32], index: 0, kind: input, shape index: {}, may-alias: {0,7}]   ;;  %s2138_s1 = inlined_call_operand.vmem [shape: f32[2,1,8], index: 1, kind: input, shape index: {}]   ;;  %s2139_s2 = inlined_call_operand.vmem [shape: bf16[2,32,96], index: 2, kind: input, shape index: {}]   ;;  %s2140_s3 = inlined_call_operand.vmem [shape: bf16[2,32,32], index: 3, kind: input, shape index: {}]   ;;  %s2141_s4 = inlined_call_operand.vmem [shape: bf16[2,32,64], index: 4, kind: input, shape index: {}]   ;;  %s2142_s5 = inlined_call_operand.vmem [shape: bf16[2,64,32], index: 5, kind: input, shape index: {}]   ;;  %s2143_s6 = inlined_call_operand.vmem [shape: f32[2,8,96], index: 6, kind: input, shape index: {}]   ;;  %s2144_s7 = inlined_call_operand.vmem [shape: f32[16,32], index: 7, kind: output, shape index: {}, may-alias: {0,7}]  }
   0x1   :  { %2145 = sst [smem:[#allocation4_spill]] %s2137_s0  ;;  %s1882_s26 = smov 0  }
   0x2   :  { %2146 = sst [smem:[#allocation5_spill]] %s2139_s2  ;;  %s1884_s27 = smov 0  }
   0x3   :  { %s1886_s28 = smov 0  }
   0x4 LB: > { %s26_s29 = sadd.s32 1, %s1820_s26  ;;  %s29_s30 = sadd.s32 1, %s1824_s27  ;;  %s1828_s28 = sphi %s1886_s28, %s17_s28   ;;  %s1824_s27 = sphi %s1884_s27, %s2157_s27   ;;  %s1820_s26 = sphi %s1882_s26, %s2156_s26   ;;  %s1816_s25 = sphi %s1880_s25, %s2155_s25   ;;  %s1812_s24 = sphi %s1878_s24, %s2154_s24  }
   0x5   : > { %p27_p0 = scmp.ge.s32.totalorder %s26_s29, 2  ;;  %p1590_p1 = scmp.ge.s32.totalorder %s1828_s28, 1 }
   0x6   : > { %p305_p2 = scmp.lt.s32.totalorder %s1828_s28, 5 }
   0x7   : > { %s2159_s29 = smov (%p27_p0, %s26_s29), 0  ;;  %s2161_s30 = smov (!%p27_p0, %s29_s30), %s1824_s27 }
   0x8   : > { %2147 = sst [smem:[#allocation2_spill]] %s2159_s29  ;;  %p306_p3 = pnand %p1590_p1, %p305_p2 }
   0x9   : > { %p31_p4 = scmp.ge.s32.totalorder %s2161_s30, 2  ;;  %p362_p5 = scmp.lt.s32.totalorder (!%p306_p3), %s1816_s25, 1 }
   0xa   : > { %309 = sbr.rel (%p306_p3) target bundleno = 2703 (0xa8f), region = 48  ;;  %p369_p6 = scmp.lt.s32.totalorder (!%p306_p3), %s1812_s24, 1 }
   0xb   : > { %s2163_s30 = smov (%p31_p4, %s2161_s30), 0  ;;  %s2149_s0 = sld [smem:[#allocation4_spill]] (!%p306_p3) }
   0xc   : > { %2148 = sst [smem:[#allocation3_spill]] %s2163_s30  ;;  %s2150_s2 = sld [smem:[#allocation5_spill]] (!%p306_p3) }
   0xd   : > { %p1602_p7 = scmp.ne.s32.totalorder (!%p306_p3), %s1812_s24, 0 }
  0x11   : > { %s2165_s25 = smov (!%p362_p5, %s1816_s25), 1  ;;  %vm403_vm0 = vcmask (!%p1602_p7), 261120  }
  0x12   : > { %s370_s8 = scalar_select %p369_p6, %s1812_s24, 1 }
  0x13   : > { %s1591_s9 = sshll.u32 %s2165_s25, 3  ;;  %401 = sbr.rel (%p1602_p7) target bundleno = 26 (0x1a), region = 52 }
  0x14   : > { %s365_s15 = scalar_lea.vmem %s2149_s0, %s1591_s9  ;;  %s1632_s16 = sshll.u32 %s370_s8, 4 }
  0x15   : > { %s373_s19 = scalar_lea.vmem %s2150_s2, %s1632_s16  ;;  %s1928_s22 = scalar_lea.vmem %s2140_s3, %s1632_s16  ;;  %v402_v0 = vld [vmem:[%s365_s15] sm:$0xff] (!%p1602_p7) }
  0x16   : > { %s1933_s29 = scalar_lea.vmem %s2141_s4, %s1632_s16  ;;  %s1635_s10 = sshll.u32 %s370_s8, 5 }
  0x17   : > { %s1938_s13 = scalar_lea.vmem %s2142_s5, %s1635_s10  ;;  %s1600_s14 = sshll.u32 %s370_s8, 3 }
  0x18   : > { %s392_s18 = scalar_lea.vmem %s2143_s6, %s1600_s14  ;;  %s1946_s21 = scalar_lea.vmem %s2144_s7, %s1591_s9 }
  0x19   : > { %404 = vst.msk [vmem:[%s1946_s21] sm:$0xff] (!%p1602_p7), %vm403_vm0, %v402_v0 }
  0x1a PF: > { %v1766_v1 = vld [vmem:[%s373_s19] sm:$0xff]   ;;  %v1830_v2 = vmov 0.0   ;;  %v1767_v3 = vld [vmem:[%s373_s19 + $0x8] sm:$0xff]   ;;  %vm1831_vm1 = vmmov 0   ;;  %vm428_vm2 = vcmask 261120   ;;  %v412_v6 = vlaneseq  ;;  %s1832_s0 = smov 112   ;;  %s2151_s8 = scalar_lea.vmem %s2138_s1, %s2165_s25 }
  0x1b   : > { %1658 = vmatprep.subr.bf16.mxu0 %v1830_v2  ;;  %1666 = vmatprep.subr.bf16.mxu1 %v1830_v2  ;;  %v1969_v9 = vld [vmem:[%s392_s18] sm:$0xff]  ;;  %s1833_s2 = smov 96   ;;  %v1834_v17 = vmov 1983009808   ;;  %v1835_v23 = vmov 1934713408  }
  0x1c   : > { %1659 = vmatpush3.bf16.msra.mxu0 %v1766_v1  ;;  %1662 = vmatprep.mubr.msk.bf16.mxu0 %vm1831_vm1, %v1830_v2  ;;  %v1966_v7 = vshrl.u32 %v412_v6, 7  ;;  %v478_v18 = vunpack.c.l.s4 %v1834_v17  ;;  %v509_v24 = vunpack.c.l.s4 %v1835_v23  ;;  %vm842_vm3 = vcmask 130048   ;;  %s1836_s25 = smov 64   ;;  %s1837_s9 = smov 16  }
  0x1d   : > { %1660 = vmatprep.subr.bf16.mxu0 %v1830_v2  ;;  %1668 = vmatprep.mubr.msk.bf16.mxu1 %vm1831_vm1, %v1830_v2  ;;  %vm946_vm4 = vcmask 64512   ;;  %vm974_vm5 = vcmask 1043456   ;;  %vm1384_vm6 = vcmask 523264  }
  0x1e   : > { %v414_v8 = vsub.s32 0, %v1966_v7  ;;  %v479_v19 = vunpack.c.0.s8 %v478_v18  ;;  %v510_v26 = vunpack.c.0.s8 %v509_v24 }
  0x20   : > { %v1955_v4 = vld [vmem:[%s1946_s21] sm:$0xff]  ;;  %1661 = vmatpush3.bf16.msra.mxu0 %v1767_v3  ;;  %v415_v10 = vrot.slane %v1969_v9, %v414_v8  ;;  %v1984_v22 = vsub.s32 %v479_v19, %v1966_v7  ;;  %v1994_v34 = vsub.s32 %v510_v26, %v1966_v7 }
  0x21   : > { %v406_v5 = vpack.c.bf16 %v1955_v4, %v1955_v4  ;;  %1672 = vmatprep.subr.bf16.mxu0 %v1830_v2 }
  0x23   : > { %1663 = vmatmul.mubr.msk.bf16.vlgmr.msra.gmra.mrb[0].mxu0 %vm428_vm2, %v406_v5 }
  0x24   : > { %1674 = vmatprep.mubr.msk.bf16.mxu0 %vm1831_vm1, %v1830_v2 }
  0xf6   : > { %v466_v11 = vpop.f32.mrb[0].mxu0 }
  0xf7   : > { %v1972_v12 = vadd.f32 %v466_v11, %v415_v10  ;;  %v1664_v13 = vpop.f32.mrb[1].mxu0 }
  0xf8   : > { %v469_v14 = vpop.f32.mrb[2].mxu0 }
  0xf9   : > { %473 = vrot.lane.b32.xlu0 %v1972_v12, %s1832_s0  ;;  %v1665_v15 = vpop.f32.mrb[3].mxu0  ;;  %v476_v21 = vcombine.high %v1972_v12, %v1830_v2  ;;  %v483_v30 = vrot.slane %v1972_v12, %v1984_v22 }
  0xfb   : > { %v490_v27 = vrot.slane %v476_v21, %v1984_v22 }
  0xfd   : > { %592 = vrot.lane.b32.xlu0 %v1972_v12, %s1833_s2 }
 0x16b   : > { %v1976_v16 = vpop.permute.xlu0 %473 }
 0x16c   : > { %594 = vrot.lane.b32.xlu1 %v1976_v16, %s1833_s2  ;;  %v491_v20 = vcombine.high %v1976_v16, %v1830_v2  ;;  %v498_v28 = vrot.slane %v1976_v16, %v1984_v22 }
 0x16e   : > { %v505_v25 = vrot.slane %v491_v20, %v1984_v22  ;;  %v506_v35 = vcombine.low %v483_v30, %v498_v28  ;;  %v507_v36 = vcombine.high %v483_v30, %v498_v28 }
 0x16f   : > { %v593_v29 = vpop.permute.xlu0 %592 }
 0x170   : > { %v522_v31 = vcombine.low %v490_v27, %v505_v25  ;;  %v523_v32 = vcombine.high %v490_v27, %v505_v25  ;;  %v598_v33 = vcombine.high %v593_v29, %v1830_v2  ;;  %v605_v38 = vrot.slane %v593_v29, %v1984_v22 }
 0x171   : > { %v514_v47 = vrot.slane %v506_v35, %v1994_v34  ;;  %v521_v48 = vrot.slane %v507_v36, %v1994_v34  ;;  %v1614_v35 = vld [vmem:[%s2151_s8] ss:$0 sm:$0xff] }
 0x172   : > { %v530_v41 = vrot.slane %v522_v31, %v1994_v34  ;;  %v537_v42 = vrot.slane %v523_v32, %v1994_v34  ;;  %v612_v43 = vrot.slane %v598_v33, %v1984_v22 }
 0x173   : > { %v542_v59 = vcombine.low %v514_v47, %v521_v48  ;;  %v1606_v60 = vcombine.high %v514_v47, %v521_v48 }
 0x174   : > { %v558_v53 = vcombine.low %v530_v41, %v537_v42  ;;  %v1607_v54 = vcombine.high %v530_v41, %v537_v42 }
 0x175   : > { %v549_v10 = vrot.slane %v542_v59, %v1984_v22  ;;  %v557_v11 = vrot.slane %v1606_v60, %v1984_v22 }
 0x176   : > { %v565_v1 = vrot.slane %v558_v53, %v1984_v22  ;;  %v573_v8 = vrot.slane %v1607_v54, %v1984_v22 }
 0x177   : > { %v574_v20 = vcombine.low %v549_v10, %v557_v11 }
 0x178   : > { %v582_v17 = vcombine.low %v565_v1, %v573_v8 }
 0x179   : > { %v581_v27 = vrot.slane %v574_v20, %v1994_v34 }
 0x17a   : > { %v589_v24 = vrot.slane %v582_v17, %v1994_v34 }
 0x17c   : > { %v590_v28 = vcombine.low %v581_v27, %v589_v24  ;;  %v591_v29 = vcombine.high %v581_v27, %v589_v24 }
 0x17e   : > { %v836_v30 = vpack.c.bf16 %v590_v28, %v590_v28  ;;  %v837_v31 = vpack.c.bf16 %v591_v29, %v591_v29 }
 0x1de   : > { %v595_v37 = vpop.permute.xlu1 %594 }
 0x1df   : > { %v613_v39 = vcombine.high %v595_v37, %v1830_v2  ;;  %v620_v40 = vrot.slane %v595_v37, %v1984_v22 }
 0x1e1   : > { %v627_v44 = vrot.slane %v613_v39, %v1984_v22  ;;  %v628_v45 = vcombine.low %v605_v38, %v620_v40  ;;  %v629_v46 = vcombine.high %v605_v38, %v620_v40 }
 0x1e3   : > { %v636_v49 = vrot.slane %v628_v45, %v1994_v34  ;;  %v643_v50 = vrot.slane %v629_v46, %v1994_v34  ;;  %v644_v51 = vcombine.low %v612_v43, %v627_v44  ;;  %v645_v52 = vcombine.high %v612_v43, %v627_v44 }
 0x1e5   : > { %v652_v55 = vrot.slane %v644_v51, %v1994_v34  ;;  %v659_v56 = vrot.slane %v645_v52, %v1994_v34  ;;  %v664_v57 = vcombine.low %v636_v49, %v643_v50  ;;  %v1608_v58 = vcombine.high %v636_v49, %v643_v50 }
 0x1e7   : > { %v680_v61 = vcombine.low %v652_v55, %v659_v56  ;;  %v1609_v62 = vcombine.high %v652_v55, %v659_v56  ;;  %v671_v63 = vrot.slane %v664_v57, %v1984_v22  ;;  %v679_v0 = vrot.slane %v1608_v58, %v1984_v22 }
 0x1e9   : > { %v687_v3 = vrot.slane %v680_v61, %v1984_v22  ;;  %v695_v5 = vrot.slane %v1609_v62, %v1984_v22  ;;  %v696_v6 = vcombine.low %v671_v63, %v679_v0 }
 0x1eb   : > { %v704_v13 = vcombine.low %v687_v3, %v695_v5  ;;  %v703_v14 = vrot.slane %v696_v6, %v1994_v34 }
 0x1ed   : > { %v711_v15 = vrot.slane %v704_v13, %v1994_v34 }
 0x1ef   : > { %v712_v18 = vcombine.low %v703_v14, %v711_v15  ;;  %v713_v19 = vcombine.high %v703_v14, %v711_v15 }
 0x1f1   : > { %v838_v21 = vpack.c.bf16 %v712_v18, %v712_v18  ;;  %v839_v23 = vpack.c.bf16 %v713_v19, %v713_v19 }
 0x1f3   : > { %v847_v25 = vsel %vm842_vm3, %v838_v21, 0  ;;  %v893_v26 = vsel %vm842_vm3, %v839_v23, 0 }
 0x1f4   : > { %1667 = vmatpush3.bf16.xpose.msra.mxu1 %v847_v25  ;;  %1673 = vmatpush3.bf16.xpose.msra.mxu0 %v893_v26 }
 0x1f5   : > { %1678 = vmatprep.subr.bf16.mxu1 %v1830_v2  ;;  %1684 = vmatprep.subr.bf16.mxu0 %v1830_v2 }
 0x1fb   : > { %1669 = vmatmul.mubr.msk.bf16.vlgmr.msra.gmra.mrb[0].mxu1 %vm842_vm3, %v836_v30  ;;  %1675 = vmatmul.mubr.msk.bf16.vlgmr.msra.gmra.mrb[4].mxu0 %vm842_vm3, %v837_v31 }
 0x1fc   : > { %1680 = vmatprep.mubr.msk.bf16.mxu1 %vm1831_vm1, %v1830_v2  ;;  %1686 = vmatprep.mubr.msk.bf16.mxu0 %vm1831_vm1, %v1830_v2 }
 0x2ce   : > { %v883_v32 = vpop.f32.mrb[0].mxu1  ;;  %v929_v33 = vpop.f32.mrb[4].mxu0 }
 0x2cf   : > { %v935_v36 = vmul.f32 0.25, %v883_v32  ;;  %v936_v37 = vmul.f32 0.25, %v929_v33  ;;  %v1670_v38 = vpop.f32.mrb[1].mxu1  ;;  %v1676_v39 = vpop.f32.mrb[5].mxu0 }
 0x2d0   : > { %v886_v40 = vpop.f32.mrb[2].mxu1  ;;  %v932_v41 = vpop.f32.mrb[6].mxu0 }
 0x2d1   : > { %v1671_v42 = vpop.f32.mrb[3].mxu1  ;;  %v1677_v43 = vpop.f32.mrb[7].mxu0  ;;  %v944_v44 = vadd.f32 %v1614_v35, %v935_v36  ;;  %v945_v45 = vadd.f32 %v1614_v35, %v936_v37 }
 0x2d2   : > { %v1768_v42 = vld [vmem:[%s1928_s22] sm:$0xff]  }
 0x2d3   : > { %v947_v46 = vsel %vm946_vm4, %v944_v44, -inf  ;;  %v950_v47 = vsel %vm946_vm4, %v945_v45, -inf }
 0x2d4   : > { %948 = vmax.xlane.f32.xlu1 %v947_v46  ;;  %951 = vmax.xlane.f32.xlu0 %v950_v47 }
 0x361   : > { %v949_v48 = vpop.xlane.xlu1 %948  ;;  %v952_v49 = vpop.xlane.xlu0 %951 }
 0x362   : > { %v953_v50 = vsub.f32 %v944_v44, %v949_v48  ;;  %v954_v51 = vsub.f32 %v945_v45, %v952_v49 }
 0x364   : > { %v955_v52 = vmul.f32 1.442695, %v953_v50  ;;  %v957_v53 = vmul.f32 1.442695, %v954_v51 }
 0x366   : > { %1776 = vpow2.f32 %v955_v52 }
 0x367   : > { %1778 = vpow2.f32 %v957_v53 }
 0x370   : > { %v1777_v54 = vpop.eup %1776 }
 0x371   : > { %v1779_v55 = vpop.eup %1778  ;;  %v959_v56 = vsel %vm946_vm4, %v1777_v54, 0.0 }
 0x372   : > { %960 = vadd.xlane.f32.xlu0 %v959_v56  ;;  %v962_v57 = vsel %vm946_vm4, %v1779_v55, 0.0 }
 0x373   : > { %963 = vadd.xlane.f32.xlu1 %v962_v57 }
 0x384   : > { %716 = vrot.lane.b32.xlu1 %v1976_v16, %s1836_s25 }
 0x388   : > { %714 = vrot.lane.b32.xlu0 %v1972_v12, %s1836_s25 }
 0x3ff   : > { %v961_v58 = vpop.xlane.xlu0 %960 }
 0x400   : > { %v964_v59 = vpop.xlane.xlu1 %963  ;;  %1780 = vrcp.f32 %v961_v58 }
 0x401   : > { %1782 = vrcp.f32 %v964_v59 }
 0x403   : > { %v715_v60 = vpop.permute.xlu0 %714 }
 0x404   : > { %v717_v61 = vpop.permute.xlu1 %716  ;;  %v720_v62 = vcombine.high %v715_v60, %v1830_v2  ;;  %v727_v63 = vrot.slane %v715_v60, %v1984_v22 }
 0x405   : > { %v735_v0 = vcombine.high %v717_v61, %v1830_v2  ;;  %v742_v1 = vrot.slane %v717_v61, %v1984_v22 }
 0x406   : > { %v734_v3 = vrot.slane %v720_v62, %v1984_v22 }
 0x407   : > { %v749_v5 = vrot.slane %v735_v0, %v1984_v22  ;;  %v750_v6 = vcombine.low %v727_v63, %v742_v1  ;;  %v751_v16 = vcombine.high %v727_v63, %v742_v1  ;;  %v1769_v63 = vld [vmem:[%s1928_s22 + $0x8] sm:$0xff]  }
 0x409   : > { %v758_v12 = vrot.slane %v750_v6, %v1994_v34  ;;  %v765_v8 = vrot.slane %v751_v16, %v1994_v34  ;;  %v766_v10 = vcombine.low %v734_v3, %v749_v5  ;;  %v767_v11 = vcombine.high %v734_v3, %v749_v5 }
 0x40a   : > { %v1781_v27 = vpop.eup %1780 }
 0x40b   : > { %v774_v13 = vrot.slane %v766_v10, %v1994_v34  ;;  %v781_v14 = vrot.slane %v767_v11, %v1994_v34  ;;  %v786_v15 = vcombine.low %v758_v12, %v765_v8  ;;  %v1610_v17 = vcombine.high %v758_v12, %v765_v8  ;;  %v1783_v30 = vpop.eup %1782 }
 0x40c   : > { %v968_v33 = vmul.f32 %v1783_v30, %v1779_v55  ;;  %v967_v35 = vmul.f32 %v1781_v27, %v1777_v54 }
 0x40d   : > { %v793_v18 = vrot.slane %v786_v15, %v1984_v22  ;;  %v802_v19 = vcombine.low %v774_v13, %v781_v14  ;;  %v1611_v20 = vcombine.high %v774_v13, %v781_v14  ;;  %v801_v21 = vrot.slane %v1610_v17, %v1984_v22 }
 0x40e   : > { %v969_v40 = vpack.c.bf16 %v967_v35, %v967_v35  ;;  %v970_v41 = vpack.c.bf16 %v968_v33, %v968_v33 }
 0x40f   : > { %v809_v23 = vrot.slane %v802_v19, %v1984_v22  ;;  %v817_v24 = vrot.slane %v1611_v20, %v1984_v22  ;;  %v818_v25 = vcombine.low %v793_v18, %v801_v21 }
 0x411   : > { %v826_v26 = vcombine.low %v809_v23, %v817_v24  ;;  %v825_v28 = vrot.slane %v818_v25, %v1994_v34 }
 0x413   : > { %v833_v29 = vrot.slane %v826_v26, %v1994_v34 }
 0x415   : > { %v834_v31 = vcombine.low %v825_v28, %v833_v29  ;;  %v835_v32 = vcombine.high %v825_v28, %v833_v29 }
 0x417   : > { %v840_v36 = vpack.c.bf16 %v834_v31, %v834_v31  ;;  %v841_v37 = vpack.c.bf16 %v835_v32, %v835_v32 }
 0x419   : > { %v976_v38 = vsel %vm974_vm5, %v840_v36, 0  ;;  %v1022_v39 = vsel %vm974_vm5, %v841_v37, 0  ;;  %v1770_v37 = vld [vmem:[%s1933_s29] sm:$0xff]  }
 0x41a   : > { %1679 = vmatpush3.bf16.msra.mxu1 %v976_v38  ;;  %1685 = vmatpush3.bf16.msra.mxu0 %v1022_v39  ;;  %v1771_v38 = vld [vmem:[%s1933_s29 + $0x8] sm:$0xff]  }
 0x41b   : > { %1690 = vmatprep.subr.bf16.mxu1 %v1830_v2  ;;  %1698 = vmatprep.subr.bf16.mxu0 %v1830_v2 }
 0x41d   : > { %1681 = vmatmul.mubr.msk.bf16.vlgmr.msra.gmra.mrb[4].mxu1 %vm946_vm4, %v969_v40  ;;  %1687 = vmatmul.mubr.msk.bf16.vlgmr.msra.gmra.mrb[8].mxu0 %vm946_vm4, %v970_v41  ;;  %v1266_v41 = vsub.s32 4, %v1966_v7 }
 0x41e   : > { %1694 = vmatprep.mubr.msk.bf16.mxu1 %vm1831_vm1, %v1830_v2  ;;  %1702 = vmatprep.mubr.msk.bf16.mxu0 %vm1831_vm1, %v1830_v2 }
 0x41f   : > { %1691 = vmatpush3.bf16.msra.mxu1 %v1768_v42  ;;  %1699 = vmatpush3.bf16.msra.mxu0 %v1770_v37  ;;  %v1271_v42 = vsub.s32 5, %v1966_v7 }
 0x420   : > { %1692 = vmatprep.subr.bf16.mxu1 %v1830_v2  ;;  %1700 = vmatprep.subr.bf16.mxu0 %v1830_v2 }
 0x423   : > { %1693 = vmatpush3.bf16.msra.mxu1 %v1769_v63  ;;  %1701 = vmatpush3.bf16.msra.mxu0 %v1771_v38 }
 0x424   : > { %1706 = vmatprep.subr.bf16.mxu1 %v1830_v2 }
 0x4f0   : > { %v1012_v43 = vpop.f32.mrb[4].mxu1  ;;  %v1058_v44 = vpop.f32.mrb[8].mxu0 }
 0x4f1   : > { %v1064_v45 = vcombine.high %v1012_v43, %v1830_v2  ;;  %v1071_v46 = vrot.slane %v1012_v43, %v1984_v22  ;;  %v1079_v47 = vcombine.high %v1058_v44, %v1830_v2  ;;  %v1086_v48 = vrot.slane %v1058_v44, %v1984_v22  ;;  %v1682_v49 = vpop.f32.mrb[5].mxu1  ;;  %v1688_v50 = vpop.f32.mrb[9].mxu0 }
 0x4f2   : > { %v1015_v51 = vpop.f32.mrb[6].mxu1  ;;  %v1061_v52 = vpop.f32.mrb[10].mxu0  ;;  %v1267_v43 = vrot.slane %v1969_v9, %v1266_v41  ;;  %v1772_v50 = vld [vmem:[%s1938_s13] sm:$0xff]  }
 0x4f3   : > { %v1078_v53 = vrot.slane %v1064_v45, %v1984_v22  ;;  %v1093_v54 = vrot.slane %v1079_v47, %v1984_v22  ;;  %v1094_v55 = vcombine.low %v1071_v46, %v1086_v48  ;;  %v1095_v56 = vcombine.high %v1071_v46, %v1086_v48  ;;  %v1683_v57 = vpop.f32.mrb[7].mxu1  ;;  %v1689_v58 = vpop.f32.mrb[11].mxu0  ;;  %v1773_v51 = vld [vmem:[%s1938_s13 + $0x8] sm:$0xff]   ;;  %v1774_v52 = vld [vmem:[%s1938_s13 + $0x10] sm:$0xff]  }
 0x4f4   : > { %v1272_v46 = vrot.slane %v1969_v9, %v1271_v42 }
 0x4f5   : > { %v1102_v59 = vrot.slane %v1094_v55, %v1994_v34  ;;  %v1109_v60 = vrot.slane %v1095_v56, %v1994_v34  ;;  %v1110_v61 = vcombine.low %v1078_v53, %v1093_v54  ;;  %v1111_v62 = vcombine.high %v1078_v53, %v1093_v54  ;;  %v1775_v53 = vld [vmem:[%s1938_s13 + $0x18] sm:$0xff]  }
 0x4f6   : > { %v1281_v54 = vsub.s32 2, %v1966_v7 }
 0x4f7   : > { %v1118_v0 = vrot.slane %v1110_v61, %v1994_v34  ;;  %v1125_v1 = vrot.slane %v1111_v62, %v1994_v34  ;;  %v1130_v3 = vcombine.low %v1102_v59, %v1109_v60  ;;  %v1617_v5 = vcombine.high %v1102_v59, %v1109_v60 }
 0x4f8   : > { %v1282_v55 = vrot.slane %v1969_v9, %v1281_v54 }
 0x4f9   : > { %v1137_v6 = vrot.slane %v1130_v3, %v1984_v22  ;;  %v1145_v16 = vrot.slane %v1617_v5, %v1984_v22  ;;  %v1146_v12 = vcombine.low %v1118_v0, %v1125_v1  ;;  %v1618_v8 = vcombine.high %v1118_v0, %v1125_v1 }
 0x4fb   : > { %v1153_v10 = vrot.slane %v1146_v12, %v1984_v22  ;;  %v1161_v11 = vrot.slane %v1618_v8, %v1984_v22  ;;  %v1162_v13 = vcombine.low %v1137_v6, %v1145_v16  ;;  %v1192_v22 = vsub.s32 1, %v1966_v7 }
 0x4fc   : > { %v1358_v12 = vsub.s32 3, %v1966_v7 }
 0x4fd   : > { %v1170_v14 = vcombine.low %v1153_v10, %v1161_v11  ;;  %v1169_v15 = vrot.slane %v1162_v13, %v1994_v34  ;;  %v1193_v24 = vrot.slane %v1969_v9, %v1192_v22 }
 0x4fe   : > { %v1359_v8 = vrot.slane %v1969_v9, %v1358_v12 }
 0x4ff   : > { %v1177_v17 = vrot.slane %v1170_v14, %v1994_v34 }
 0x501   : > { %v1179_v18 = vcombine.high %v1169_v15, %v1177_v17  ;;  %v1178_v19 = vcombine.low %v1169_v15, %v1177_v17 }
 0x503   : > { %1181 = vrot.lane.b32.xlu1 %v1179_v18, %s1837_s9 }
 0x575   : > { %v1182_v20 = vpop.permute.xlu1 %1181 }
 0x576   : > { %v1184_v21 = vsel %vm842_vm3, %v1178_v19, %v1182_v20 }
 0x577   : > { %v1185_v23 = vpack.c.bf16 %v1184_v21, %v1184_v21 }
 0x579   : > { %1695 = vmatmul.mubr.msk.bf16.vlgmr.msra.gmra.mrb[8].mxu1 %vm428_vm2, %v1185_v23 }
 0x57a   : > { %1714 = vmatprep.mubr.msk.bf16.mxu1 %vm1831_vm1, %v1830_v2  ;;  %1707 = vmatpush3.bf16.msra.mxu1 %v1772_v50 }
 0x57b   : > { %1708 = vmatprep.subr.bf16.mxu1 %v1830_v2 }
 0x57e   : > { %1709 = vmatpush3.bf16.msra.mxu1 %v1773_v51 }
 0x57f   : > { %1710 = vmatprep.subr.bf16.mxu1 %v1830_v2 }
 0x582   : > { %1711 = vmatpush3.bf16.msra.mxu1 %v1774_v52 }
 0x583   : > { %1712 = vmatprep.subr.bf16.mxu1 %v1830_v2 }
 0x586   : > { %1713 = vmatpush3.bf16.msra.mxu1 %v1775_v53 }
 0x64c   : > { %v1243_v25 = vpop.f32.mrb[8].mxu1 }
 0x64d   : > { %v1244_v34 = vadd.f32 %v1243_v25, %v1193_v24  ;;  %v1696_v26 = vpop.f32.mrb[9].mxu1 }
 0x64e   : > { %v1246_v27 = vpop.f32.mrb[10].mxu1  ;;  %v1444_v26 = vsub.s32 6, %v1966_v7 }
 0x64f   : > { %v1697_v28 = vpop.f32.mrb[11].mxu1  ;;  %v1249_v29 = vadd.f32 %v1244_v34, %v1955_v4  ;;  %v1449_v27 = vsub.s32 7, %v1966_v7 }
 0x650   : > { %v1445_v28 = vrot.slane %v1969_v9, %v1444_v26 }
 0x651   : > { %v1250_v30 = vsel %vm428_vm2, %v1249_v29, 0.0 }
 0x652   : > { %1251 = vadd.xlane.f32.xlu0 %v1250_v30  ;;  %v1450_v30 = vrot.slane %v1969_v9, %v1449_v27 }
 0x6df   : > { %v1252_v31 = vpop.xlane.xlu0 %1251 }
 0x6e0   : > { %v1254_v32 = vmul.f32 0.03125, %v1252_v31 }
 0x6e2   : > { %v1255_v33 = vsub.f32 %v1249_v29, %v1254_v32 }
 0x6e4   : > { %v1256_v35 = vmul.f32 %v1255_v33, %v1255_v33 }
 0x6e6   : > { %v1257_v36 = vsel %vm428_vm2, %v1256_v35, 0.0 }
 0x6e7   : > { %1258 = vadd.xlane.f32.xlu1 %v1257_v36 }
 0x774   : > { %v1259_v39 = vpop.xlane.xlu1 %1258 }
 0x775   : > { %v1260_v4 = vmul.f32 0.03125, %v1259_v39 }
 0x777   : > { %v1261_v40 = vadd.f32 1e-12, %v1260_v4 }
 0x779   : > { %1784 = vrsqrt.f32 %v1261_v40 }
 0x783   : > { %v1785_v44 = vpop.eup %1784 }
 0x784   : > { %v1263_v45 = vmul.f32 %v1785_v44, %v1255_v33 }
 0x786   : > { %v1268_v47 = vmul.f32 %v1267_v43, %v1263_v45 }
 0x788   : > { %v1273_v48 = vadd.f32 %v1272_v46, %v1268_v47 }
 0x78a   : > { %v1274_v49 = vpack.c.bf16 %v1273_v48, %v1273_v48 }
 0x78c   : > { %1703 = vmatmul.mubr.msk.bf16.vlgmr.msra.gmra.mrb[12].mxu0 %vm428_vm2, %v1274_v49 }
 0x85f   : > { %v1332_v56 = vpop.f32.mrb[12].mxu0 }
 0x860   : > { %v1333_v57 = vadd.f32 %v1332_v56, %v1282_v55  ;;  %v1704_v58 = vpop.f32.mrb[13].mxu0 }
 0x861   : > { %v1335_v59 = vpop.f32.mrb[14].mxu0 }
 0x862   : > { %v1339_v60 = vmul.f32 0.044715, %v1333_v57  ;;  %v1705_v61 = vpop.f32.mrb[15].mxu0  ;;  %v1338_v5 = vmul.f32 0.5, %v1333_v57 }
 0x864   : > { %v1340_v62 = vmul.f32 %v1339_v60, %v1333_v57 }
 0x866   : > { %v1341_v63 = vmul.f32 %v1340_v62, %v1333_v57 }
 0x868   : > { %v1342_v0 = vadd.f32 %v1341_v63, %v1333_v57 }
 0x86a   : > { %v1343_v1 = vmul.f32 0.7978846, %v1342_v0 }
 0x86c   : > { %1786 = vtanh.f32 %v1343_v1 }
 0x876   : > { %v1787_v3 = vpop.eup %1786 }
 0x877   : > { %v1345_v6 = vadd.f32 1.0, %v1787_v3 }
 0x879   : > { %v1346_v2 = vmul.f32 %v1345_v6, %v1338_v5 }
 0x87b   : > { %v1347_v16 = vpack.c.bf16 %v1346_v2, %v1346_v2 }
 0x87d   : > { %1715 = vmatmul.mubr.msk.bf16.vlgmr.msra.gmra.mrb[12].mxu1 %vm1384_vm6, %v1347_v16 }
 0x950   : > { %v1422_v10 = vpop.f32.mrb[12].mxu1 }
 0x951   : > { %v1423_v11 = vadd.f32 %v1422_v10, %v1359_v8  ;;  %v1716_v13 = vpop.f32.mrb[13].mxu1 }
 0x952   : > { %v1425_v14 = vpop.f32.mrb[14].mxu1 }
 0x953   : > { %v1717_v15 = vpop.f32.mrb[15].mxu1  ;;  %v1428_v17 = vadd.f32 %v1423_v11, %v1273_v48 }
 0x955   : > { %v1429_v18 = vsel %vm428_vm2, %v1428_v17, 0.0 }
 0x956   : > { %1430 = vadd.xlane.f32.xlu0 %v1429_v18 }
 0x9e3   : > { %v1431_v19 = vpop.xlane.xlu0 %1430 }
 0x9e4   : > { %v1432_v20 = vmul.f32 0.03125, %v1431_v19 }
 0x9e6   : > { %v1433_v21 = vsub.f32 %v1428_v17, %v1432_v20 }
 0x9e8   : > { %v1434_v23 = vmul.f32 %v1433_v21, %v1433_v21 }
 0x9ea   : > { %v1435_v22 = vsel %vm428_vm2, %v1434_v23, 0.0 }
 0x9eb   : > { %1436 = vadd.xlane.f32.xlu0 %v1435_v22 }
 0xa78   : > { %v1437_v24 = vpop.xlane.xlu0 %1436 }
 0xa79   : > { %v1438_v25 = vmul.f32 0.03125, %v1437_v24 }
 0xa7b   : > { %v1439_v34 = vadd.f32 1e-12, %v1438_v25 }
 0xa7d   : > { %1788 = vrsqrt.f32 %v1439_v34 }
 0xa87   : > { %v1789_v29 = vpop.eup %1788 }
 0xa88   : > { %v1441_v31 = vmul.f32 %v1789_v29, %v1433_v21 }
 0xa8a   : > { %v1446_v32 = vmul.f32 %v1445_v28, %v1441_v31 }
 0xa8c   : > { %v1451_v33 = vadd.f32 %v1450_v30, %v1446_v32 }
 0xa8e   : > { %1452 = vst.msk [vmem:[%s1946_s21] sm:$0xff] %vm428_vm2, %v1451_v33 }
 0xa8f PF: > { %s17_s28 = sadd.s32 1, %s1828_s28   ;;  %s2152_s29 = sld [smem:[#allocation2_spill]] }
 0xa90   : > { %p14_p8 = scmp.ge.s32.totalorder %s17_s28, 6   ;;  %s2153_s12 = sld [smem:[#allocation3_spill]] }
 0xa91   : > { %s2154_s24 = smov %s1820_s26  ;;  %s2155_s25 = smov %s1824_s27 }
 0xa92   :  { %16 = sbr.rel (!%p14_p8) target bundleno = 4 (0x4), region = 100 }
 0xa95   : > { %s2156_s26 = smov %s2152_s29 }
 0xa96   : > { %s2157_s27 = smov %s2153_s12 }

</bundles_post_ra>
